<compile_context>
chip_gen: v7x
topology: tpu7x:2x2x1
jax: 0.10.0
libtpu: 0.0.40
codegen_flags: <defaults>
</compile_context>

<pallas_src>
import functools

import jax
import jax.numpy as jnp
from jax.experimental import pallas as pl
from jax.experimental.pallas import tpu as pltpu

ENCODING_SIZE = 256
POLICY_LATENT = 30
ACTION_N = 4
OBS_PAD = 31

SLAB = 128                      # lane-dense slab width (input and output)
VALUE_COL = POLICY_LATENT       # output col 30: state value (tanh)
COMM_OFF = 32                   # output cols [32:62): comm (relu)
MEANS_OFF = 64                  # output cols [64:68): means (tanh)
NB_OFF = 32                     # packed-input cols [32:32+30N): flat neighbors
OBS_OFF = 96                    # packed-input cols [96:96+obs_dim): observation

MXU_DTYPE = jnp.bfloat16        # MXU-native everywhere; f32 accumulate + f32 epilogue


def _round_up(x, m):
    return ((x + m - 1) // m) * m


# ------------------------------ fused kernel ------------------------------- #

def _walker_fused_kernel(xin_ref, w1_ref, b1_ref, w2_ref, b2_ref,
                         wh_ref, bh_ref, wrec_ref, br_ref, wm_ref, bm_ref,
                         out_ref):
    f32 = jnp.float32
    mxu = w1_ref.dtype

    xin = xin_ref[...]                                       # (TB,128) bf16 packed input

    # ---- step 0: down_sampler (obs -> 256 -> 256, ReLU).  Obs zero-pad folded
    #      into w1's rows; neighbor/zero lanes hit zero rows of w1 (exact no-op).
    #      bias-add + ReLU + bf16 cast fused so only the bf16 copy lives on.
    h1 = jnp.maximum(
        jnp.dot(xin, w1_ref[...], preferred_element_type=f32) + b1_ref[...], 0.0
    ).astype(mxu)
    h2 = jnp.maximum(
        jnp.dot(h1, w2_ref[...], preferred_element_type=f32) + b2_ref[...], 0.0
    ).astype(mxu)

    # ---- step 0: fused policy+value head, PRE-activation.
    #      cols [0:30) = policy pre-act, col 30 = value pre-act, zero elsewhere.
    head = jnp.dot(h2, wh_ref[...], preferred_element_type=f32) + bh_ref[...]
    head_relu = jnp.maximum(head, 0.0)

    # ---- step 1: recurr_policy as ONE (TB,128)@(128,128) dot.  The merged operand
    #      carries relu(policy) in cols [0:30) and the packed neighbors in cols
    #      [32:62); obs/value lanes multiply zero rows of wrec.  Result is the comm
    #      PRE-activation in cols [32:62), zero elsewhere.
    step1_in = (head_relu + xin.astype(f32)).astype(mxu)
    comm_pre = jnp.dot(step1_in, wrec_ref[...], preferred_element_type=f32) + br_ref[...]
    comm_relu = jnp.maximum(comm_pre, 0.0)

    # ---- step 2: to_means, PRE-activation in cols [64:68), zero elsewhere.
    means_pre = jnp.dot(comm_relu.astype(mxu), wm_ref[...],
                        preferred_element_type=f32) + bm_ref[...]

    # ---- single masked epilogue: tanh only on lanes {30} U [64:68), ReLU elsewhere.
    #      Lane mask hoisted to (1,128); one full-width tanh pass total.
    lane = jax.lax.broadcasted_iota(jnp.int32, (1, SLAB), 1)
    tanh_lane = (lane == VALUE_COL) | ((lane >= MEANS_OFF) & (lane < MEANS_OFF + ACTION_N))
    out_ref[...] = jnp.where(tanh_lane,
                             jnp.tanh(head + means_pre),     # value + means lanes
                             head_relu + comm_relu           # policy + comm lanes (disjoint)
                             ).astype(out_ref.dtype)


# ------------------------------- wrapper ----------------------------------- #

@functools.partial(jax.jit, static_argnames=("block_rows",))
def walker_policy_pipeline(obs, neighbors, kp, *, block_rows=512):
    """forward_initial -> forward_communicate -> forward_probs, fused & batch-gridded.

    obs:       (B, obs_dim) f32, obs_dim <= 31 (must match prepare_kernel_params)
    neighbors: (B, N, 30)   f32
    returns (policy_dist (B,30), state_vals (B,1), comm (B,30), means (B,4)) in f32.
    """
    B, obs_dim = obs.shape
    _, n_nb, lat = neighbors.shape
    assert lat == POLICY_LATENT
    nb_w = n_nb * POLICY_LATENT
    assert NB_OFF + nb_w <= OBS_OFF, "packed-input layout supports num_neighbors <= 2"
    assert OBS_OFF + obs_dim <= SLAB and obs_dim <= OBS_PAD

    # Batch tile: multiple of 8, capped at block_rows (default 512: good MXU M on
    # v6e/v7x while staying far inside v7x's 64 MiB VMEM with double-buffering).
    tb = _round_up(min(block_rows, _round_up(B, 8)), 8)
    b_pad = _round_up(B, tb)
    grid = (b_pad // tb,)

    # Pack obs + flat neighbors into one lane-dense bf16 slab (wrapper-side plumbing).
    xin = jnp.zeros((b_pad, SLAB), jnp.float32)
    xin = xin.at[:B, NB_OFF:NB_OFF + nb_w].set(neighbors.reshape(B, nb_w))
    xin = xin.at[:B, OBS_OFF:OBS_OFF + obs_dim].set(obs)
    xin = xin.astype(MXU_DTYPE)

    weights = (kp["w1"], kp["b1"], kp["w2"], kp["b2"], kp["wh"], kp["bh"],
               kp["wrec"], kp["br"], kp["wm"], kp["bm"])

    act_spec = pl.BlockSpec((tb, SLAB), lambda i: (i, 0))
    w_specs = [pl.BlockSpec(w.shape, lambda i: (0, 0)) for w in weights]  # VMEM-resident

    out = pl.pallas_call(
        _walker_fused_kernel,
        out_shape=jax.ShapeDtypeStruct((b_pad, SLAB), MXU_DTYPE),
        grid=grid,
        in_specs=[act_spec] + w_specs,
        out_specs=act_spec,
        compiler_params=pltpu.CompilerParams(dimension_semantics=("parallel",)),
    )(xin, *weights)

    out = out[:B].astype(jnp.float32)
    policy = out[:, :POLICY_LATENT]
    value = out[:, VALUE_COL:VALUE_COL + 1]
    comm = out[:, COMM_OFF:COMM_OFF + POLICY_LATENT]
    means = out[:, MEANS_OFF:MEANS_OFF + ACTION_N]
    return policy, value, comm, means


# --------------------------- parameter handling ----------------------------- #

def _init_linear_pt(key, out_dim, in_dim):
    # Mirrors init_params: normal(0,1), row-normalized over the input dim; bias = 0.
    w = jax.random.normal(key, (out_dim, in_dim), dtype=jnp.float32)
    w = w / jnp.sqrt(jnp.sum(w * w, axis=1, keepdims=True))
    b = jnp.zeros((out_dim,), jnp.float32)
    return w, b


def make_torch_params(key, num_neighbors):
    """Parameters in PyTorch (out, in) layout, f32 — the module's ground truth."""
    ks = jax.random.split(key, 6)
    w1, b1 = _init_linear_pt(ks[0], ENCODING_SIZE, OBS_PAD)        # down_sampler[0]
    w2, b2 = _init_linear_pt(ks[1], ENCODING_SIZE, ENCODING_SIZE)  # down_sampler[2]
    wp, bp = _init_linear_pt(ks[2], POLICY_LATENT, ENCODING_SIZE)  # policy[0]
    wv, bv = _init_linear_pt(ks[3], 1, ENCODING_SIZE)              # v_net[0]
    wm, bm = _init_linear_pt(ks[4], ACTION_N, POLICY_LATENT)       # to_means[0]
    in_dim = POLICY_LATENT * (num_neighbors + 1)
    _, br = _init_linear_pt(ks[5], POLICY_LATENT, in_dim)          # recurr_policy[0]
    # init_recurr_policy: weight <- [eye(30), zeros(30,30)] (implies num_neighbors=1)
    wr = jnp.concatenate(
        [jnp.eye(POLICY_LATENT, dtype=jnp.float32),
         jnp.zeros((POLICY_LATENT, in_dim - POLICY_LATENT), jnp.float32)], axis=1)
    return dict(w1=w1, b1=b1, w2=w2, b2=b2, wp=wp, bp=bp, wv=wv, bv=bv,
                wr=wr, br=br, wm=wm, bm=bm)


def prepare_kernel_params(p, obs_dim, num_neighbors):
    """One-time packing: transpose to (in,out), place W1 on the packed obs lanes,
    fuse policy+value heads, merge recurr_policy self/neighbor blocks into one
    (128,128) weight, map comm/means into the output slab, cast MXU operands to
    bf16 (biases stay f32 for the f32 epilogue)."""
    f32, mxu = jnp.float32, MXU_DTYPE
    nb_w = POLICY_LATENT * num_neighbors
    assert obs_dim <= OBS_PAD and OBS_OFF + obs_dim <= SLAB
    assert NB_OFF + nb_w <= OBS_OFF

    # down_sampler[0]: only the rows the packed obs lanes use (zero-pad folded in).
    w1 = jnp.zeros((SLAB, ENCODING_SIZE), f32).at[
        OBS_OFF:OBS_OFF + obs_dim, :].set(jnp.transpose(p["w1"])[:obs_dim, :])
    b1 = p["b1"].reshape(1, -1).astype(f32)
    w2 = jnp.transpose(p["w2"]).astype(mxu)                        # (256, 256)
    b2 = p["b2"].reshape(1, -1).astype(f32)

    # fused policy+value head -> slab cols [0:30)=policy, col 30=value.
    wh = jnp.zeros((ENCODING_SIZE, SLAB), f32)
    wh = wh.at[:, :POLICY_LATENT].set(jnp.transpose(p["wp"]))
    wh = wh.at[:, VALUE_COL:VALUE_COL + 1].set(jnp.transpose(p["wv"]))
    bh = jnp.zeros((1, SLAB), f32)
    bh = bh.at[0, :POLICY_LATENT].set(p["bp"])
    bh = bh.at[0, VALUE_COL].set(p["bv"][0])

    # merged recurr_policy: rows [0:30) read relu(policy), rows [32:32+nb_w) read
    # the packed neighbor lanes; output cols [32:62).  (Cat order [policy, nb] kept.)
    wrec = jnp.zeros((SLAB, SLAB), f32)
    wrec = wrec.at[:POLICY_LATENT, COMM_OFF:COMM_OFF + POLICY_LATENT].set(
        jnp.transpose(p["wr"][:, :POLICY_LATENT]))
    wrec = wrec.at[NB_OFF:NB_OFF + nb_w, COMM_OFF:COMM_OFF + POLICY_LATENT].set(
        jnp.transpose(p["wr"][:, POLICY_LATENT:]))
    br = jnp.zeros((1, SLAB), f32).at[0, COMM_OFF:COMM_OFF + POLICY_LATENT].set(p["br"])

    # to_means: rows [32:62) -> cols [64:68).
    wm = jnp.zeros((SLAB, SLAB), f32).at[
        COMM_OFF:COMM_OFF + POLICY_LATENT,
        MEANS_OFF:MEANS_OFF + ACTION_N].set(jnp.transpose(p["wm"]))
    bm = jnp.zeros((1, SLAB), f32).at[0, MEANS_OFF:MEANS_OFF + ACTION_N].set(p["bm"])

    return dict(w1=w1.astype(mxu), b1=b1, w2=w2, b2=b2,
                wh=wh.astype(mxu), bh=bh,
                wrec=wrec.astype(mxu), br=br,
                wm=wm.astype(mxu), bm=bm)


# ----------------------- pure-JAX reference (for checking) ------------------ #

def reference_pipeline(obs, neighbors, p, obs_dim):
    """Mirrors the module semantics with the same bf16 MXU-operand casts."""
    f32, mxu = jnp.float32, MXU_DTYPE
    B = obs.shape[0]

    def lin(a, w, b):
        return jnp.dot(a.astype(mxu), jnp.transpose(w).astype(mxu),
                       preferred_element_type=f32) + b

    x = jnp.zeros((B, OBS_PAD), f32).at[:, :obs_dim].set(obs)
    h1 = jnp.maximum(lin(x, p["w1"], p["b1"]), 0.0)
    h2 = jnp.maximum(lin(h1, p["w2"], p["b2"]), 0.0)
    policy = jnp.maximum(lin(h2, p["wp"], p["bp"]), 0.0)
    value = jnp.tanh(lin(h2, p["wv"], p["bv"]))
    cat = jnp.concatenate([policy, neighbors.reshape(B, -1)], axis=1)
    comm = jnp.maximum(lin(cat, p["wr"], p["br"]), 0.0)
    means = jnp.tanh(lin(comm, p["wm"], p["bm"]))
    return policy, value, comm, means


# --------------------------------- main ------------------------------------- #

if __name__ == "__main__":
    key = jax.random.PRNGKey(0)
    k_param, k_obs, k_nb, k_wr, k_obs2, k_nb2 = jax.random.split(key, 6)

    num_neighbors = 1   # init_recurr_policy's [eye(30), zeros(30,30)] implies 1 neighbor
    obs_dim = 17        # observation is zero-padded to 31 (folded into W1 here)

    tparams = make_torch_params(k_param, num_neighbors)
    kparams = prepare_kernel_params(tparams, obs_dim, num_neighbors)

    # ---- small demo batch (single grid step) ----
    B = 8
    obs = jax.random.normal(k_obs, (B, obs_dim), dtype=jnp.float32)
    neighbors = jax.random.normal(k_nb, (B, num_neighbors, POLICY_LATENT), dtype=jnp.float32)

    policy, value, comm, means = walker_policy_pipeline(obs, neighbors, kparams)
    jax.block_until_ready((policy, value, comm, means))

    assert policy.shape == (B, POLICY_LATENT)
    assert value.shape == (B, 1)
    assert comm.shape == (B, POLICY_LATENT)
    assert means.shape == (B, ACTION_N)

    rp, rv, rc, rm = reference_pipeline(obs, neighbors, tparams, obs_dim)
    for got, ref in ((policy, rp), (value, rv), (comm, rc), (means, rm)):
        err = float(jnp.max(jnp.abs(got - ref)))
        assert jnp.allclose(got, ref, atol=2e-2, rtol=2e-2), err

    # ---- gridded path (grid > 1, padded batch) with a randomized recurrent weight
    #      so the neighbor lanes of the merged step-1 dot are actually exercised ----
    wr_rand = jax.random.normal(
        k_wr, (POLICY_LATENT, POLICY_LATENT * (num_neighbors + 1)), dtype=jnp.float32)
    wr_rand = wr_rand / jnp.sqrt(jnp.sum(wr_rand * wr_rand, axis=1, keepdims=True))
    tparams_rand = dict(tparams, wr=wr_rand)
    kparams_rand = prepare_kernel_params(tparams_rand, obs_dim, num_neighbors)

    B2 = 300
    obs2 = jax.random.normal(k_obs2, (B2, obs_dim), dtype=jnp.float32)
    neighbors2 = jax.random.normal(k_nb2, (B2, num_neighbors, POLICY_LATENT), dtype=jnp.float32)
    outs2 = walker_policy_pipeline(obs2, neighbors2, kparams_rand, block_rows=128)  # grid=(3,)
    jax.block_until_ready(outs2)
    refs2 = reference_pipeline(obs2, neighbors2, tparams_rand, obs_dim)
    for got, ref in zip(outs2, refs2):
        err = float(jnp.max(jnp.abs(got - ref)))
        assert jnp.allclose(got, ref, atol=2e-2, rtol=2e-2), err

    print("KERNEL_OK")
</pallas_src>

<mosaic_0001>
module attributes {stable_mosaic.version = 11 : i64} {
  func.func @_walker_fused_kernel(%arg0: i32, %arg1: memref<8x128xbf16, #tpu.memory_space<vmem>>, %arg2: memref<128x256xbf16, #tpu.memory_space<vmem>>, %arg3: memref<1x256xf32, #tpu.memory_space<vmem>>, %arg4: memref<256x256xbf16, #tpu.memory_space<vmem>>, %arg5: memref<1x256xf32, #tpu.memory_space<vmem>>, %arg6: memref<256x128xbf16, #tpu.memory_space<vmem>>, %arg7: memref<1x128xf32, #tpu.memory_space<vmem>>, %arg8: memref<128x128xbf16, #tpu.memory_space<vmem>>, %arg9: memref<1x128xf32, #tpu.memory_space<vmem>>, %arg10: memref<128x128xbf16, #tpu.memory_space<vmem>>, %arg11: memref<1x128xf32, #tpu.memory_space<vmem>>, %arg12: memref<8x128xbf16, #tpu.memory_space<vmem>>) attributes {dimension_semantics = [#tpu.dimension_semantics<parallel>], iteration_bounds = array<i64: 1>, scalar_prefetch = 0 : i64, scratch_operands = 0 : i64, tpu.core_type = #tpu.core_type<tc>, window_params = [{transform_indices = @transform_0, window_bounds = array<i64: 8, 128>}, {pipeline_mode = #tpu.pipeline_mode<synchronous>, transform_indices = @transform_1, window_bounds = array<i64: 128, 256>}, {pipeline_mode = #tpu.pipeline_mode<synchronous>, transform_indices = @transform_2, window_bounds = array<i64: 1, 256>}, {pipeline_mode = #tpu.pipeline_mode<synchronous>, transform_indices = @transform_3, window_bounds = array<i64: 256, 256>}, {pipeline_mode = #tpu.pipeline_mode<synchronous>, transform_indices = @transform_4, window_bounds = array<i64: 1, 256>}, {pipeline_mode = #tpu.pipeline_mode<synchronous>, transform_indices = @transform_5, window_bounds = array<i64: 256, 128>}, {pipeline_mode = #tpu.pipeline_mode<synchronous>, transform_indices = @transform_6, window_bounds = array<i64: 1, 128>}, {pipeline_mode = #tpu.pipeline_mode<synchronous>, transform_indices = @transform_7, window_bounds = array<i64: 128, 128>}, {pipeline_mode = #tpu.pipeline_mode<synchronous>, transform_indices = @transform_8, window_bounds = array<i64: 1, 128>}, {pipeline_mode = #tpu.pipeline_mode<synchronous>, transform_indices = @transform_9, window_bounds = array<i64: 128, 128>}, {pipeline_mode = #tpu.pipeline_mode<synchronous>, transform_indices = @transform_10, window_bounds = array<i64: 1, 128>}, {transform_indices = @transform_11, window_bounds = array<i64: 8, 128>}]} {
    %c0 = arith.constant 0 : index
    %c0_0 = arith.constant 0 : index
    %0 = vector.load %arg1[%c0, %c0_0] : memref<8x128xbf16, #tpu.memory_space<vmem>>, vector<8x128xbf16>
    %c0_1 = arith.constant 0 : index
    %c0_2 = arith.constant 0 : index
    %1 = vector.load %arg2[%c0_1, %c0_2] : memref<128x256xbf16, #tpu.memory_space<vmem>>, vector<128x256xbf16>
    %cst = arith.constant dense<0.000000e+00> : vector<8x256xf32>
    %2 = tpu.matmul %0, %1, %cst {dimension_numbers = #tpu.dot_dimension_numbers<[1], [0], [0], [1], [0, 0, 1, 1], [], []>} : vector<8x128xbf16>, vector<128x256xbf16>, vector<8x256xf32> -> vector<8x256xf32>
    %c0_3 = arith.constant 0 : index
    %c0_4 = arith.constant 0 : index
    %3 = vector.load %arg3[%c0_3, %c0_4] : memref<1x256xf32, #tpu.memory_space<vmem>>, vector<1x256xf32>
    %4 = vector.broadcast %3 : vector<1x256xf32> to vector<8x256xf32>
    %5 = arith.addf %2, %4 : vector<8x256xf32>
    %cst_5 = arith.constant 0.000000e+00 : f32
    %6 = vector.broadcast %cst_5 : f32 to vector<8x256xf32>
    %7 = arith.maximumf %5, %6 : vector<8x256xf32>
    %8 = arith.truncf %7 : vector<8x256xf32> to vector<8x256xbf16>
    %c0_6 = arith.constant 0 : index
    %c0_7 = arith.constant 0 : index
    %9 = vector.load %arg4[%c0_6, %c0_7] : memref<256x256xbf16, #tpu.memory_space<vmem>>, vector<256x256xbf16>
    %cst_8 = arith.constant dense<0.000000e+00> : vector<8x256xf32>
    %10 = tpu.matmul %8, %9, %cst_8 {dimension_numbers = #tpu.dot_dimension_numbers<[1], [0], [0], [1], [0, 0, 1, 1], [], []>} : vector<8x256xbf16>, vector<256x256xbf16>, vector<8x256xf32> -> vector<8x256xf32>
    %c0_9 = arith.constant 0 : index
    %c0_10 = arith.constant 0 : index
    %11 = vector.load %arg5[%c0_9, %c0_10] : memref<1x256xf32, #tpu.memory_space<vmem>>, vector<1x256xf32>
    %12 = vector.broadcast %11 : vector<1x256xf32> to vector<8x256xf32>
    %13 = arith.addf %10, %12 : vector<8x256xf32>
    %cst_11 = arith.constant 0.000000e+00 : f32
    %14 = vector.broadcast %cst_11 : f32 to vector<8x256xf32>
    %15 = arith.maximumf %13, %14 : vector<8x256xf32>
    %16 = arith.truncf %15 : vector<8x256xf32> to vector<8x256xbf16>
    %c0_12 = arith.constant 0 : index
    %c0_13 = arith.constant 0 : index
    %17 = vector.load %arg6[%c0_12, %c0_13] : memref<256x128xbf16, #tpu.memory_space<vmem>>, vector<256x128xbf16>
    %cst_14 = arith.constant dense<0.000000e+00> : vector<8x128xf32>
    %18 = tpu.matmul %16, %17, %cst_14 {dimension_numbers = #tpu.dot_dimension_numbers<[1], [0], [0], [1], [0, 0, 1, 1], [], []>} : vector<8x256xbf16>, vector<256x128xbf16>, vector<8x128xf32> -> vector<8x128xf32>
    %c0_15 = arith.constant 0 : index
    %c0_16 = arith.constant 0 : index
    %19 = vector.load %arg7[%c0_15, %c0_16] : memref<1x128xf32, #tpu.memory_space<vmem>>, vector<1x128xf32>
    %20 = vector.broadcast %19 : vector<1x128xf32> to vector<8x128xf32>
    %21 = arith.addf %18, %20 : vector<8x128xf32>
    %cst_17 = arith.constant 0.000000e+00 : f32
    %22 = vector.broadcast %cst_17 : f32 to vector<8x128xf32>
    %23 = arith.maximumf %21, %22 : vector<8x128xf32>
    %24 = arith.extf %0 : vector<8x128xbf16> to vector<8x128xf32>
    %25 = arith.addf %23, %24 : vector<8x128xf32>
    %26 = arith.truncf %25 : vector<8x128xf32> to vector<8x128xbf16>
    %c0_18 = arith.constant 0 : index
    %c0_19 = arith.constant 0 : index
    %27 = vector.load %arg8[%c0_18, %c0_19] : memref<128x128xbf16, #tpu.memory_space<vmem>>, vector<128x128xbf16>
    %cst_20 = arith.constant dense<0.000000e+00> : vector<8x128xf32>
    %28 = tpu.matmul %26, %27, %cst_20 {dimension_numbers = #tpu.dot_dimension_numbers<[1], [0], [0], [1], [0, 0, 1, 1], [], []>} : vector<8x128xbf16>, vector<128x128xbf16>, vector<8x128xf32> -> vector<8x128xf32>
    %c0_21 = arith.constant 0 : index
    %c0_22 = arith.constant 0 : index
    %29 = vector.load %arg9[%c0_21, %c0_22] : memref<1x128xf32, #tpu.memory_space<vmem>>, vector<1x128xf32>
    %30 = vector.broadcast %29 : vector<1x128xf32> to vector<8x128xf32>
    %31 = arith.addf %28, %30 : vector<8x128xf32>
    %cst_23 = arith.constant 0.000000e+00 : f32
    %32 = vector.broadcast %cst_23 : f32 to vector<8x128xf32>
    %33 = arith.maximumf %31, %32 : vector<8x128xf32>
    %34 = arith.truncf %33 : vector<8x128xf32> to vector<8x128xbf16>
    %c0_24 = arith.constant 0 : index
    %c0_25 = arith.constant 0 : index
    %35 = vector.load %arg10[%c0_24, %c0_25] : memref<128x128xbf16, #tpu.memory_space<vmem>>, vector<128x128xbf16>
    %cst_26 = arith.constant dense<0.000000e+00> : vector<8x128xf32>
    %36 = tpu.matmul %34, %35, %cst_26 {dimension_numbers = #tpu.dot_dimension_numbers<[1], [0], [0], [1], [0, 0, 1, 1], [], []>} : vector<8x128xbf16>, vector<128x128xbf16>, vector<8x128xf32> -> vector<8x128xf32>
    %c0_27 = arith.constant 0 : index
    %c0_28 = arith.constant 0 : index
    %37 = vector.load %arg11[%c0_27, %c0_28] : memref<1x128xf32, #tpu.memory_space<vmem>>, vector<1x128xf32>
    %38 = vector.broadcast %37 : vector<1x128xf32> to vector<8x128xf32>
    %39 = arith.addf %36, %38 : vector<8x128xf32>
    %40 = tpu.iota {dimensions = array<i32: 1>} : vector<1x128xi32>
    %c30_i32 = arith.constant 30 : i32
    %41 = vector.broadcast %c30_i32 : i32 to vector<1x128xi32>
    %42 = arith.cmpi eq, %40, %41 : vector<1x128xi32>
    %c64_i32 = arith.constant 64 : i32
    %43 = vector.broadcast %c64_i32 : i32 to vector<1x128xi32>
    %44 = arith.cmpi sge, %40, %43 : vector<1x128xi32>
    %c68_i32 = arith.constant 68 : i32
    %45 = vector.broadcast %c68_i32 : i32 to vector<1x128xi32>
    %46 = arith.cmpi slt, %40, %45 : vector<1x128xi32>
    %47 = arith.andi %44, %46 : vector<1x128xi1>
    %48 = arith.ori %42, %47 : vector<1x128xi1>
    %49 = arith.addf %21, %39 : vector<8x128xf32>
    %50 = math.tanh %49 : vector<8x128xf32>
    %51 = arith.addf %23, %33 : vector<8x128xf32>
    %52 = vector.shape_cast %48 : vector<1x128xi1> to vector<1x128xi1>
    %53 = vector.broadcast %52 : vector<1x128xi1> to vector<8x128xi1>
    %54 = arith.select %53, %50, %51 : vector<8x128xi1>, vector<8x128xf32>
    %55 = arith.truncf %54 : vector<8x128xf32> to vector<8x128xbf16>
    %c0_29 = arith.constant 0 : index
    %c0_30 = arith.constant 0 : index
    %56 = vector.load %arg12[%c0_29, %c0_30] : memref<8x128xbf16, #tpu.memory_space<vmem>>, vector<8x128xbf16>
    tpu.vector_store %arg12[%c0_29, %c0_30], %55 {strides = array<i32>} : memref<8x128xbf16, #tpu.memory_space<vmem>>, vector<8x128xbf16>,
    return
  }
  func.func @transform_0(%arg0: i32) -> (i32, i32) {
    %c0_i32 = arith.constant 0 : i32
    %c0_i32_0 = arith.constant 0 : i32
    return %arg0, %c0_i32 : i32, i32
  }
  func.func @transform_1(%arg0: i32) -> (i32, i32) {
    %c0_i32 = arith.constant 0 : i32
    %c0_i32_0 = arith.constant 0 : i32
    %c0_i32_1 = arith.constant 0 : i32
    return %c0_i32, %c0_i32_0 : i32, i32
  }
  func.func @transform_2(%arg0: i32) -> (i32, i32) {
    %c0_i32 = arith.constant 0 : i32
    %c0_i32_0 = arith.constant 0 : i32
    %c0_i32_1 = arith.constant 0 : i32
    return %c0_i32, %c0_i32_0 : i32, i32
  }
  func.func @transform_3(%arg0: i32) -> (i32, i32) {
    %c0_i32 = arith.constant 0 : i32
    %c0_i32_0 = arith.constant 0 : i32
    %c0_i32_1 = arith.constant 0 : i32
    return %c0_i32, %c0_i32_0 : i32, i32
  }
  func.func @transform_4(%arg0: i32) -> (i32, i32) {
    %c0_i32 = arith.constant 0 : i32
    %c0_i32_0 = arith.constant 0 : i32
    %c0_i32_1 = arith.constant 0 : i32
    return %c0_i32, %c0_i32_0 : i32, i32
  }
  func.func @transform_5(%arg0: i32) -> (i32, i32) {
    %c0_i32 = arith.constant 0 : i32
    %c0_i32_0 = arith.constant 0 : i32
    %c0_i32_1 = arith.constant 0 : i32
    return %c0_i32, %c0_i32_0 : i32, i32
  }
  func.func @transform_6(%arg0: i32) -> (i32, i32) {
    %c0_i32 = arith.constant 0 : i32
    %c0_i32_0 = arith.constant 0 : i32
    %c0_i32_1 = arith.constant 0 : i32
    return %c0_i32, %c0_i32_0 : i32, i32
  }
  func.func @transform_7(%arg0: i32) -> (i32, i32) {
    %c0_i32 = arith.constant 0 : i32
    %c0_i32_0 = arith.constant 0 : i32
    %c0_i32_1 = arith.constant 0 : i32
    return %c0_i32, %c0_i32_0 : i32, i32
  }
  func.func @transform_8(%arg0: i32) -> (i32, i32) {
    %c0_i32 = arith.constant 0 : i32
    %c0_i32_0 = arith.constant 0 : i32
    %c0_i32_1 = arith.constant 0 : i32
    return %c0_i32, %c0_i32_0 : i32, i32
  }
  func.func @transform_9(%arg0: i32) -> (i32, i32) {
    %c0_i32 = arith.constant 0 : i32
    %c0_i32_0 = arith.constant 0 : i32
    %c0_i32_1 = arith.constant 0 : i32
    return %c0_i32, %c0_i32_0 : i32, i32
  }
  func.func @transform_10(%arg0: i32) -> (i32, i32) {
    %c0_i32 = arith.constant 0 : i32
    %c0_i32_0 = arith.constant 0 : i32
    %c0_i32_1 = arith.constant 0 : i32
    return %c0_i32, %c0_i32_0 : i32, i32
  }
  func.func @transform_11(%arg0: i32) -> (i32, i32) {
    %c0_i32 = arith.constant 0 : i32
    %c0_i32_0 = arith.constant 0 : i32
    return %arg0, %c0_i32 : i32, i32
  }
}

</mosaic_0001>

<bundles_post_ra>
// kernel: walker_policy_pipeline.1
= control target key start
LH: loop header
LB: loop body
LE: loop exit
PB: predicated region body
PF: predicated region fallthrough
CT: control target
= control target key end

     0   :  { %16 = vsyncpa [#allocation3], 0  ;;  %s1491_s0 = inlined_call_operand.vmem [shape: bf16[8,128], index: 0, kind: input, shape index: {}]   ;;  %s1492_s1 = inlined_call_operand.hbm [shape: bf16[128,256], index: 1, kind: input, shape index: {}]   ;;  %s1493_s2 = inlined_call_operand.vmem [shape: f32[1,256], index: 2, kind: input, shape index: {}]   ;;  %s1494_s3 = inlined_call_operand.hbm [shape: bf16[256,256], index: 3, kind: input, shape index: {}]   ;;  %s1495_s4 = inlined_call_operand.vmem [shape: f32[1,256], index: 4, kind: input, shape index: {}]   ;;  %s1496_s5 = inlined_call_operand.hbm [shape: bf16[256,128], index: 5, kind: input, shape index: {}]   ;;  %s1497_s6 = inlined_call_operand.vmem [shape: f32[1,128], index: 6, kind: input, shape index: {}]   ;;  %s1498_s7 = inlined_call_operand.vmem [shape: bf16[128,128], index: 7, kind: input, shape index: {}]   ;;  %s1499_s8 = inlined_call_operand.vmem [shape: f32[1,128], index: 8, kind: input, shape index: {}]   ;;  %s1500_s9 = inlined_call_operand.hbm [shape: bf16[128,128], index: 9, kind: input, shape index: {}]   ;;  %s1501_s10 = inlined_call_operand.vmem [shape: f32[1,128], index: 10, kind: input, shape index: {}]   ;;  %s1502_s11 = inlined_call_operand.vmem [shape: bf16[8,128], index: 11, kind: output, shape index: {}]  }
   0x1   :  { %17 = vsyncpa [#allocation5], 0 }
   0x2   :  { %18 = vsyncpa [#allocation8], 0  ;;  %s1296_s17 = smov [#allocation4]   ;;  %s1297_s19 = smov [#allocation2]  }
   0x3   :  { %s40_s18 = sshll.u32 %s1296_s17, 4  ;;  %s26_s20 = sshll.u32 %s1297_s19, 4  ;;  %s41_s18 = int_to_ptr.vmem [resolvable:$true] %s40_s18  ;;  %s1367_s20 = int_to_ptr.vmem [resolvable:$true] %s26_s20 }
   0x4   :  { %s1202_s23 = scalar_lea.hbm %s1494_s3, 4096 }
   0x5   :  { %p1203_p0 = scmp.ne.s32.totalorder %s1494_s3, %s1202_s23  ;;  %p1206_p1 = scmp.lt.u32.totalorder %s1202_s23, %s1494_s3 }
   0x7   :  { %p1208_p2 = pnand %p1206_p1, %p1203_p0 }
   0x9   :  { %1211 = shalt.err (!%p1208_p2)
}
   0xa   :  { %s1212_s28 = scalar_lea.vmem %s41_s18, 4096  ;;  %p1217_p4 = scmp.lt.s32.totalorder %s41_s18, %s41_s18 }
   0xb   :  { %p1213_p3 = scmp.ne.s32.totalorder %s41_s18, %s1212_s28  ;;  %p1218_p5 = scmp.lt.s32.totalorder %s1212_s28, %s1212_s28 }
   0xd   :  { %p1219_p6 = por %p1218_p5, %p1217_p4 }
   0xf   :  { %p1220_p7 = pnand %p1219_p6, %p1213_p3 }
  0x11   :  { %1223 = shalt.err (!%p1220_p7)
}
  0x12   :  { %s1298_s29 = smov 128   ;;  %s1299_s30 = smov 8  }
  0x13   :  { %46 = dma.hbm_to_vmem [thread:$0]  %s1494_s3, 4096, %s41_s18, [#allocation5], %s1298_s29, %s1298_s29, %s1299_s30  }
  0x14   :  { %s1224_s16 = scalar_lea.hbm %s1492_s1, 2048 }
  0x15   :  { %p1225_p8 = scmp.ne.s32.totalorder %s1492_s1, %s1224_s16  ;;  %p1228_p9 = scmp.lt.u32.totalorder %s1224_s16, %s1492_s1 }
  0x17   :  { %p1230_p10 = pnand %p1228_p9, %p1225_p8 }
  0x19   :  { %1233 = shalt.err (!%p1230_p10)
}
  0x1a   :  { %s1234_s23 = scalar_lea.vmem %s1367_s20, 2048  ;;  %p1239_p12 = scmp.lt.s32.totalorder %s1367_s20, %s1367_s20 }
  0x1b   :  { %p1235_p11 = scmp.ne.s32.totalorder %s1367_s20, %s1234_s23  ;;  %p1240_p13 = scmp.lt.s32.totalorder %s1234_s23, %s1234_s23 }
  0x1d   :  { %p1241_p0 = por %p1240_p13, %p1239_p12 }
  0x1f   :  { %p1242_p1 = pnand %p1241_p0, %p1235_p11 }
  0x21   :  { %1245 = shalt.err (!%p1242_p1)
}
  0x22   :  { %32 = dma.hbm_to_vmem [thread:$0]  %s1492_s1, 2048, %s1367_s20, [#allocation3], %s1298_s29, %s1298_s29, %s1299_s30  }
  0x23   :  { %s1300_s24 = smov [#allocation6]   ;;  %s1246_s28 = scalar_lea.hbm %s1496_s5, 2048 }
  0x24   :  { %s54_s25 = sshll.u32 %s1300_s24, 4  ;;  %p1247_p2 = scmp.ne.s32.totalorder %s1496_s5, %s1246_s28  ;;  %s55_s25 = int_to_ptr.vmem [resolvable:$true] %s54_s25 }
  0x25   :  { %p1250_p3 = scmp.lt.u32.totalorder %s1246_s28, %s1496_s5 }
  0x27   :  { %p1252_p4 = pnand %p1250_p3, %p1247_p2 }
  0x29   :  { %1255 = shalt.err (!%p1252_p4)
}
  0x2a   :  { %s1256_s16 = scalar_lea.vmem %s55_s25, 2048  ;;  %p1261_p6 = scmp.lt.s32.totalorder %s55_s25, %s55_s25 }
  0x2b   :  { %p1257_p5 = scmp.ne.s32.totalorder %s55_s25, %s1256_s16  ;;  %p1262_p7 = scmp.lt.s32.totalorder %s1256_s16, %s1256_s16 }
  0x2d   :  { %p1263_p8 = por %p1262_p7, %p1261_p6 }
  0x2f   :  { %p1264_p9 = pnand %p1263_p8, %p1257_p5 }
  0x31   :  { %1267 = shalt.err (!%p1264_p9)
}
  0x32   :  { %s1301_s1 = smov 64   ;;  %s1302_s20 = smov 4  }
  0x33   :  { %60 = dma.hbm_to_vmem [thread:$0]  %s1496_s5, 2048, %s55_s25, [#allocation5], %s1301_s1, %s1301_s1, %s1302_s20  }
  0x34   :  { %s1303_s17 = smov [#allocation7]   ;;  %s1268_s23 = scalar_lea.hbm %s1500_s9, 1024 }
  0x35   :  { %s72_s19 = sshll.u32 %s1303_s17, 4  ;;  %p1269_p10 = scmp.ne.s32.totalorder %s1500_s9, %s1268_s23  ;;  %s73_s19 = int_to_ptr.vmem [resolvable:$true] %s72_s19 }
  0x36   :  { %p1272_p11 = scmp.lt.u32.totalorder %s1268_s23, %s1500_s9 }
  0x38   :  { %p1274_p12 = pnand %p1272_p11, %p1269_p10 }
  0x3a   :  { %1277 = shalt.err (!%p1274_p12)
}
  0x3b   :  { %s1278_s27 = scalar_lea.vmem %s73_s19, 1024  ;;  %p1283_p0 = scmp.lt.s32.totalorder %s73_s19, %s73_s19 }
  0x3c   :  { %p1279_p13 = scmp.ne.s32.totalorder %s73_s19, %s1278_s27  ;;  %p1284_p1 = scmp.lt.s32.totalorder %s1278_s27, %s1278_s27 }
  0x3e   :  { %p1285_p2 = por %p1284_p1, %p1283_p0 }
  0x40   :  { %p1286_p3 = pnand %p1285_p2, %p1279_p13 }
  0x42   :  { %1289 = shalt.err (!%p1286_p3)
}
  0x43   :  { %78 = dma.hbm_to_vmem [thread:$0]  %s1500_s9, 1024, %s73_s19, [#allocation8], %s1301_s1, %s1301_s1, %s1302_s20  }
  0x44   :  { %1290 = dma.done.wait [#allocation3], 2048  }
  0x45   :  { %1291 = vsyncadd [#allocation3], 4294965248 }
  0x46   :  { %1292 = dma.done.wait [#allocation5], 6144  }
  0x47   :  { %1293 = vsyncadd [#allocation5], 4294961152 }
  0x48   :  { %1294 = dma.done.wait [#allocation8], 1024  }
  0x49   :  { %1295 = vsyncadd [#allocation8], 4294966272  ;;  %v1304_v0 = vmov 0   ;;  %v1096_v1 = vld [vmem:[#allocation2 + $0x4] ss:$8 sps:$4 sm:$0xff]   ;;  %v1172_v54 = vld [vmem:[#allocation6 + $0x50] sm:$0xff]   ;;  %v113_v62 = vlaneseq }
  0x4a   :  { %235 = vmatprep.mubr.bf16.mxu0 %v1304_v0  ;;  %v1098_v2 = vld [vmem:[#allocation2] ss:$8 sps:$4 sm:$0xff]   ;;  %203 = vmatprep.subr.bf16.mxu0 %v1096_v1  ;;  %v1099_v3 = vld [vmem:[#allocation2 + $0x14] ss:$8 sps:$4 sm:$0xff]   ;;  %v1101_v4 = vld [vmem:[#allocation2 + $0x10] ss:$8 sps:$4 sm:$0xff]  }
  0x4b   :  { %204 = vmatpush1.bf16.msra.mxu0 %v1098_v2  ;;  %v1102_v5 = vld [vmem:[#allocation2 + $0x24] ss:$8 sps:$4 sm:$0xff]   ;;  %v1104_v6 = vld [vmem:[#allocation2 + $0x20] ss:$8 sps:$4 sm:$0xff]   ;;  %v1105_v7 = vld [vmem:[#allocation2 + $0x34] ss:$8 sps:$4 sm:$0xff]  }
  0x4c   :  { %205 = vmatprep.subr.bf16.mxu0 %v1099_v3  ;;  %v1107_v8 = vld [vmem:[#allocation2 + $0x30] ss:$8 sps:$4 sm:$0xff]   ;;  %v1108_v9 = vld [vmem:[#allocation2 + $0x44] ss:$8 sps:$4 sm:$0xff]   ;;  %v1122_v11 = vld [vmem:[#allocation4] ss:$8 sps:$4 sm:$0xff]  }
  0x4d   :  { %v1120_v10 = vld [vmem:[#allocation4 + $0x4] ss:$8 sps:$4 sm:$0xff]   ;;  %v1123_v12 = vld [vmem:[#allocation4 + $0x14] ss:$8 sps:$4 sm:$0xff]   ;;  %v1110_v13 = vld [vmem:[#allocation2 + $0x40] ss:$8 sps:$4 sm:$0xff]  }
  0x4e   :  { %452 = vmatprep.subr.bf16.mxu1 %v1120_v10  ;;  %v1125_v14 = vld [vmem:[#allocation4 + $0x10] ss:$8 sps:$4 sm:$0xff]   ;;  %v1126_v15 = vld [vmem:[#allocation4 + $0x24] ss:$8 sps:$4 sm:$0xff]   ;;  %v1111_v16 = vld [vmem:[#allocation2 + $0x54] ss:$8 sps:$4 sm:$0xff]  }
  0x4f   :  { %206 = vmatpush1.bf16.msra.mxu0 %v1101_v4  ;;  %453 = vmatpush1.bf16.msra.mxu1 %v1122_v11  ;;  %v1113_v17 = vld [vmem:[#allocation2 + $0x50] ss:$8 sps:$4 sm:$0xff]   ;;  %v1128_v18 = vld [vmem:[#allocation4 + $0x20] ss:$8 sps:$4 sm:$0xff]   ;;  %v1129_v19 = vld [vmem:[#allocation4 + $0x34] ss:$8 sps:$4 sm:$0xff]  }
  0x50   :  { %207 = vmatprep.subr.bf16.mxu0 %v1102_v5  ;;  %454 = vmatprep.subr.bf16.mxu1 %v1123_v12  ;;  %v1114_v20 = vld [vmem:[#allocation2 + $0x64] ss:$8 sps:$4 sm:$0xff]   ;;  %v1116_v21 = vld [vmem:[#allocation2 + $0x60] ss:$8 sps:$4 sm:$0xff]   ;;  %v1131_v22 = vld [vmem:[#allocation4 + $0x30] ss:$8 sps:$4 sm:$0xff]  }
  0x51   :  { %v1132_v23 = vld [vmem:[#allocation4 + $0x44] ss:$8 sps:$4 sm:$0xff]   ;;  %v1117_v24 = vld [vmem:[#allocation2 + $0x74] ss:$8 sps:$4 sm:$0xff]   ;;  %v1119_v25 = vld [vmem:[#allocation2 + $0x70] ss:$8 sps:$4 sm:$0xff]  }
  0x52   :  { %v1134_v26 = vld [vmem:[#allocation4 + $0x40] ss:$8 sps:$4 sm:$0xff]   ;;  %v1135_v27 = vld [vmem:[#allocation4 + $0x54] ss:$8 sps:$4 sm:$0xff]   ;;  %v1137_v29 = vld [vmem:[#allocation4 + $0x50] ss:$8 sps:$4 sm:$0xff]  }
  0x53   :  { %208 = vmatpush1.bf16.msra.mxu0 %v1104_v6  ;;  %455 = vmatpush1.bf16.msra.mxu1 %v1125_v14  ;;  %v1425_v28 = vld [vmem:[%s1491_s0] sm:$0xf]  ;;  %v1138_v30 = vld [vmem:[#allocation4 + $0x64] ss:$8 sps:$4 sm:$0xff]   ;;  %v1141_v32 = vld [vmem:[#allocation4 + $0x74] ss:$8 sps:$4 sm:$0xff]  }
  0x54   :  { %209 = vmatprep.subr.bf16.mxu0 %v1105_v7  ;;  %456 = vmatprep.subr.bf16.mxu1 %v1126_v15  ;;  %v1140_v31 = vld [vmem:[#allocation4 + $0x60] ss:$8 sps:$4 sm:$0xff]   ;;  %v1143_v33 = vld [vmem:[#allocation4 + $0x70] ss:$8 sps:$4 sm:$0xff]   ;;  %v1144_v34 = vld [vmem:[#allocation4 + $0x84] ss:$8 sps:$4 sm:$0xff]  }
  0x55   :  { %v1146_v35 = vld [vmem:[#allocation4 + $0x80] ss:$8 sps:$4 sm:$0xff]   ;;  %v1147_v36 = vld [vmem:[#allocation4 + $0x94] ss:$8 sps:$4 sm:$0xff]   ;;  %v1149_v37 = vld [vmem:[#allocation4 + $0x90] ss:$8 sps:$4 sm:$0xff]  }
  0x56   :  { %v1150_v38 = vld [vmem:[#allocation4 + $0xa4] ss:$8 sps:$4 sm:$0xff]   ;;  %v1152_v39 = vld [vmem:[#allocation4 + $0xa0] ss:$8 sps:$4 sm:$0xff]   ;;  %v1153_v40 = vld [vmem:[#allocation4 + $0xb4] ss:$8 sps:$4 sm:$0xff]  }
  0x57   :  { %210 = vmatpush1.bf16.msra.mxu0 %v1107_v8  ;;  %457 = vmatpush1.bf16.msra.mxu1 %v1128_v18  ;;  %v1155_v41 = vld [vmem:[#allocation4 + $0xb0] ss:$8 sps:$4 sm:$0xff]   ;;  %v1156_v42 = vld [vmem:[#allocation4 + $0xc4] ss:$8 sps:$4 sm:$0xff]   ;;  %v1158_v43 = vld [vmem:[#allocation4 + $0xc0] ss:$8 sps:$4 sm:$0xff]  }
  0x58   :  { %211 = vmatprep.subr.bf16.mxu0 %v1108_v9  ;;  %458 = vmatprep.subr.bf16.mxu1 %v1129_v19  ;;  %v1159_v44 = vld [vmem:[#allocation4 + $0xd4] ss:$8 sps:$4 sm:$0xff]   ;;  %v1161_v45 = vld [vmem:[#allocation4 + $0xd0] ss:$8 sps:$4 sm:$0xff]   ;;  %v1162_v46 = vld [vmem:[#allocation4 + $0xe4] ss:$8 sps:$4 sm:$0xff]  }
  0x59   :  { %v1164_v47 = vld [vmem:[#allocation4 + $0xe0] ss:$8 sps:$4 sm:$0xff]   ;;  %v1165_v48 = vld [vmem:[#allocation4 + $0xf4] ss:$8 sps:$4 sm:$0xff]   ;;  %v1167_v49 = vld [vmem:[#allocation4 + $0xf0] ss:$8 sps:$4 sm:$0xff]  }
  0x5a   :  { %v1168_v50 = vld [vmem:[#allocation6 + $0x40] sm:$0xff]   ;;  %v1170_v52 = vld [vmem:[#allocation6 + $0x48] sm:$0xff]   ;;  %v1173_v55 = vld [vmem:[#allocation6 + $0x10] sm:$0xff]   ;;  %v114_v63 = vshrl.u32 %v113_v62, 7  ;;  %v1305_v19 = vmov 0.0   ;;  %vm1306_vm0 = vmmov 0  }
  0x5b   :  { %212 = vmatpush1.bf16.msra.mxu0 %v1110_v13  ;;  %459 = vmatpush1.bf16.msra.mxu1 %v1131_v22  ;;  %v1169_v51 = vld [vmem:[#allocation6] sm:$0xff]   ;;  %v1171_v53 = vld [vmem:[#allocation6 + $0x8] sm:$0xff]   ;;  %v1174_v56 = vld [vmem:[#allocation6 + $0x58] sm:$0xff]  }
  0x5c   :  { %213 = vmatprep.subr.bf16.mxu0 %v1111_v16  ;;  %460 = vmatprep.subr.bf16.mxu1 %v1132_v23  ;;  %v1175_v57 = vld [vmem:[#allocation6 + $0x18] sm:$0xff]   ;;  %v1176_v58 = vld [vmem:[#allocation6 + $0x60] sm:$0xff]   ;;  %v1178_v60 = vld [vmem:[#allocation6 + $0x68] sm:$0xff]   ;;  %v115_v0 = vsub.s32 0, %v114_v63  ;;  %v119_v2 = vsub.s32 1, %v114_v63 }
  0x5d   :  { %v1177_v59 = vld [vmem:[#allocation6 + $0x20] sm:$0xff]   ;;  %v1179_v61 = vld [vmem:[#allocation6 + $0x28] sm:$0xff]   ;;  %v1180_v15 = vld [vmem:[#allocation6 + $0x70] sm:$0xff]  }
  0x5e   :  { %v111_v1 = vld [vmem:[%s1493_s2] sm:$0x3]  ;;  %v1181_v16 = vld [vmem:[#allocation6 + $0x30] sm:$0xff]   ;;  %v1183_v18 = vld [vmem:[#allocation6 + $0x38] sm:$0xff]  }
  0x5f   :  { %214 = vmatpush1.bf16.msra.mxu0 %v1113_v17  ;;  %461 = vmatpush1.bf16.msra.mxu1 %v1134_v26  ;;  %v116_v3 = vrot.slane %v111_v1, %v115_v0  ;;  %v120_v4 = vrot.slane %v111_v1, %v119_v2  ;;  %v1182_v17 = vld [vmem:[#allocation6 + $0x78] sm:$0xff]  }
  0x60   :  { %215 = vmatprep.subr.bf16.mxu0 %v1114_v20  ;;  %462 = vmatprep.subr.bf16.mxu1 %v1135_v27  ;;  %v280_v20 = vld [vmem:[%s1495_s4] sm:$0x3] }
  0x61   :  { %v289_v22 = vrot.slane %v280_v20, %v119_v2 }
  0x63   :  { %216 = vmatpush1.bf16.msra.mxu0 %v1116_v21  ;;  %463 = vmatpush1.bf16.msra.mxu1 %v1137_v29  ;;  %v285_v21 = vrot.slane %v280_v20, %v115_v0 }
  0x64   :  { %217 = vmatprep.subr.bf16.mxu0 %v1117_v24  ;;  %464 = vmatprep.subr.bf16.mxu1 %v1138_v30 }
  0x67   :  { %218 = vmatpush1.bf16.msra.mxu0 %v1119_v25  ;;  %465 = vmatpush1.bf16.msra.mxu1 %v1140_v31 }
  0x68   :  { %466 = vmatprep.subr.bf16.mxu1 %v1141_v32  ;;  %1005 = vmatprep.subr.bf16.mxu0 %v1168_v50 }
  0x6a   :  { %236 = vmatmul.mubr.bf16.vlgmr.msra.gmra.mrb[0].mxu0 %v1425_v28 }
  0x6b   :  { %467 = vmatpush1.bf16.msra.mxu1 %v1143_v33  ;;  %1006 = vmatpush3.bf16.msra.mxu0 %v1169_v51  ;;  %v1184_v33 = vld [vmem:[%s1498_s7] sm:$0xff]  }
  0x6c   :  { %468 = vmatprep.subr.bf16.mxu1 %v1144_v34  ;;  %1007 = vmatprep.subr.bf16.mxu0 %v1170_v52 }
  0x6f   :  { %469 = vmatpush1.bf16.msra.mxu1 %v1146_v35  ;;  %1008 = vmatpush3.bf16.msra.mxu0 %v1171_v53  ;;  %v1185_v35 = vld [vmem:[%s1498_s7 + $0x8] sm:$0xff]  }
  0x70   :  { %470 = vmatprep.subr.bf16.mxu1 %v1147_v36  ;;  %1009 = vmatprep.subr.bf16.mxu0 %v1172_v54  ;;  %v1186_v36 = vld [vmem:[%s1498_s7 + $0x10] sm:$0xff]   ;;  %v673_v54 = vunpack.c.l.bf16 %v1425_v28 }
  0x73   :  { %471 = vmatpush1.bf16.msra.mxu1 %v1149_v37  ;;  %1010 = vmatpush3.bf16.msra.mxu0 %v1173_v55  ;;  %v1187_v37 = vld [vmem:[%s1498_s7 + $0x18] sm:$0xff]  }
  0x74   :  { %472 = vmatprep.subr.bf16.mxu1 %v1150_v38  ;;  %1011 = vmatprep.subr.bf16.mxu0 %v1174_v56  ;;  %v1188_v38 = vld [vmem:[%s1498_s7 + $0x20] sm:$0xff]  }
  0x77   :  { %473 = vmatpush1.bf16.msra.mxu1 %v1152_v39  ;;  %1012 = vmatpush3.bf16.msra.mxu0 %v1175_v57  ;;  %v1189_v39 = vld [vmem:[%s1498_s7 + $0x28] sm:$0xff]  }
  0x78   :  { %474 = vmatprep.subr.bf16.mxu1 %v1153_v40  ;;  %1013 = vmatprep.subr.bf16.mxu0 %v1176_v58  ;;  %v1190_v40 = vld [vmem:[%s1498_s7 + $0x30] sm:$0xff]  }
  0x7b   :  { %475 = vmatpush1.bf16.msra.mxu1 %v1155_v41  ;;  %1014 = vmatpush3.bf16.msra.mxu0 %v1177_v59  ;;  %v1191_v41 = vld [vmem:[%s1498_s7 + $0x38] sm:$0xff]   ;;  %v1198_v59 = vld [vmem:[#allocation7 + $0x30] sm:$0xff]  }
  0x7c   :  { %476 = vmatprep.subr.bf16.mxu1 %v1156_v42  ;;  %1015 = vmatprep.subr.bf16.mxu0 %v1178_v60  ;;  %v1192_v42 = vld [vmem:[#allocation7] sm:$0xff]   ;;  %v1199_v60 = vld [vmem:[#allocation7 + $0x38] sm:$0xff]  }
  0x7f   :  { %477 = vmatpush1.bf16.msra.mxu1 %v1158_v43  ;;  %1016 = vmatpush3.bf16.msra.mxu0 %v1179_v61  ;;  %v1193_v43 = vld [vmem:[#allocation7 + $0x8] sm:$0xff]   ;;  %v987_v61 = vld [vmem:[%s1499_s8] ss:$0 sm:$0xff] }
  0x80   :  { %478 = vmatprep.subr.bf16.mxu1 %v1159_v44  ;;  %1017 = vmatprep.subr.bf16.mxu0 %v1180_v15  ;;  %v1194_v44 = vld [vmem:[#allocation7 + $0x10] sm:$0xff]  }
  0x83   :  { %479 = vmatpush1.bf16.msra.mxu1 %v1161_v45  ;;  %1018 = vmatpush3.bf16.msra.mxu0 %v1181_v16  ;;  %v1195_v45 = vld [vmem:[#allocation7 + $0x18] sm:$0xff]  }
  0x84   :  { %480 = vmatprep.subr.bf16.mxu1 %v1162_v46  ;;  %1019 = vmatprep.subr.bf16.mxu0 %v1182_v17  ;;  %v1196_v46 = vld [vmem:[#allocation7 + $0x20] sm:$0xff]  }
  0x87   :  { %481 = vmatpush1.bf16.msra.mxu1 %v1164_v47  ;;  %1020 = vmatpush3.bf16.msra.mxu0 %v1183_v18  ;;  %v1197_v47 = vld [vmem:[#allocation7 + $0x28] sm:$0xff]  }
  0x88   :  { %482 = vmatprep.subr.bf16.mxu1 %v1165_v48  ;;  %1045 = vmatprep.subr.bf16.mxu0 %v1305_v19 }
  0x8b   :  { %483 = vmatpush1.bf16.msra.mxu1 %v1167_v49  ;;  %v970_v49 = vld [vmem:[%s1497_s6] ss:$0 sm:$0xff] }
  0x8c   :  { %1065 = vmatprep.subr.bf16.mxu1 %v1305_v19 }
 0x13d   :  { %v237_v5 = vpop.f32.mrb[0].mxu0 }
 0x13e   :  { %v238_v6 = vadd.f32 %v237_v5, %v116_v3  ;;  %v239_v7 = vpop.f32.mrb[1].mxu0  ;;  %v996_v5 = vld [vmem:[%s1501_s10] ss:$0 sm:$0xff] }
 0x13f   :  { %v240_v8 = vadd.f32 %v239_v7, %v120_v4  ;;  %v241_v9 = vpop.f32.mrb[2].mxu0 }
 0x140   :  { %v244_v10 = vmax.f32 %v238_v6, 0.0  ;;  %v242_v11 = vpop.f32.mrb[3].mxu0 }
 0x141   :  { %v245_v12 = vmax.f32 %v240_v8, 0.0 }
 0x142   :  { %v246_v14 = vpack.c.bf16 %v244_v10, %v244_v10  ;;  %v901_v10 = vand.u32 127, %v113_v62 }
 0x143   :  { %v247_v13 = vpack.c.bf16 %v245_v12, %v245_v12 }
 0x144   :  { %vm903_vm1 = vcmp.ge.s32.totalorder %v901_v10, 64  ;;  %vm904_vm2 = vcmp.lt.s32.totalorder %v901_v10, 68  ;;  %vm902_vm3 = vcmp.eq.s32.totalorder %v901_v10, 30 }
 0x145   :  { %484 = vmatprep.mubr.bf16.mxu1 %v247_v13  ;;  %vm905_vm4 = vmand %vm903_vm1, %vm904_vm2 }
 0x146   :  { %485 = vmatmul.mubr.bf16.vlgmr.msra.gmra.mrb[0].mxu1 %v246_v14  ;;  %vm906_vm5 = vmor %vm902_vm3, %vm905_vm4 }
 0x147   :  { %1081 = vmatprep.mubr.msk.bf16.mxu1 %vm1306_vm0, %v1305_v19  ;;  %1066 = vmatpush3.bf16.msra.mxu1 %v1192_v42 }
 0x148   :  { %1067 = vmatprep.subr.bf16.mxu1 %v1305_v19 }
 0x14b   :  { %1068 = vmatpush3.bf16.msra.mxu1 %v1193_v43 }
 0x14c   :  { %1069 = vmatprep.subr.bf16.mxu1 %v1305_v19 }
 0x14f   :  { %1070 = vmatpush3.bf16.msra.mxu1 %v1194_v44 }
 0x150   :  { %1071 = vmatprep.subr.bf16.mxu1 %v1305_v19 }
 0x153   :  { %1072 = vmatpush3.bf16.msra.mxu1 %v1195_v45 }
 0x154   :  { %1073 = vmatprep.subr.bf16.mxu1 %v1305_v19 }
 0x157   :  { %1074 = vmatpush3.bf16.msra.mxu1 %v1196_v46 }
 0x158   :  { %1075 = vmatprep.subr.bf16.mxu1 %v1305_v19 }
 0x15b   :  { %1076 = vmatpush3.bf16.msra.mxu1 %v1197_v47 }
 0x15c   :  { %1077 = vmatprep.subr.bf16.mxu1 %v1305_v19 }
 0x15f   :  { %1078 = vmatpush3.bf16.msra.mxu1 %v1198_v59 }
 0x160   :  { %1079 = vmatprep.subr.bf16.mxu1 %v1305_v19 }
 0x163   :  { %1080 = vmatpush3.bf16.msra.mxu1 %v1199_v60 }
 0x219   :  { %v486_v23 = vpop.f32.mrb[0].mxu1 }
 0x21a   :  { %v487_v24 = vadd.f32 %v486_v23, %v285_v21  ;;  %v488_v25 = vpop.f32.mrb[1].mxu1 }
 0x21b   :  { %v489_v26 = vadd.f32 %v488_v25, %v289_v22  ;;  %v490_v27 = vpop.f32.mrb[2].mxu1 }
 0x21c   :  { %v493_v29 = vmax.f32 %v487_v24, 0.0  ;;  %v491_v30 = vpop.f32.mrb[3].mxu1 }
 0x21d   :  { %v494_v31 = vmax.f32 %v489_v26, 0.0 }
 0x21e   :  { %v495_v34 = vpack.c.bf16 %v493_v29, %v493_v29 }
 0x21f   :  { %v496_v32 = vpack.c.bf16 %v494_v31, %v494_v31 }
 0x221   :  { %664 = vmatprep.mubr.bf16.mxu0 %v496_v32 }
 0x222   :  { %665 = vmatmul.mubr.bf16.vlgmr.msra.gmra.mrb[4].mxu0 %v495_v34 }
 0x223   :  { %1046 = vmatpush3.bf16.msra.mxu0 %v1184_v33  ;;  %1061 = vmatprep.mubr.msk.bf16.mxu0 %vm1306_vm0, %v1305_v19 }
 0x224   :  { %1047 = vmatprep.subr.bf16.mxu0 %v1305_v19 }
 0x227   :  { %1048 = vmatpush3.bf16.msra.mxu0 %v1185_v35 }
 0x228   :  { %1049 = vmatprep.subr.bf16.mxu0 %v1305_v19 }
 0x22b   :  { %1050 = vmatpush3.bf16.msra.mxu0 %v1186_v36 }
 0x22c   :  { %1051 = vmatprep.subr.bf16.mxu0 %v1305_v19 }
 0x22f   :  { %1052 = vmatpush3.bf16.msra.mxu0 %v1187_v37 }
 0x230   :  { %1053 = vmatprep.subr.bf16.mxu0 %v1305_v19 }
 0x233   :  { %1054 = vmatpush3.bf16.msra.mxu0 %v1188_v38 }
 0x234   :  { %1055 = vmatprep.subr.bf16.mxu0 %v1305_v19 }
 0x237   :  { %1056 = vmatpush3.bf16.msra.mxu0 %v1189_v39 }
 0x238   :  { %1057 = vmatprep.subr.bf16.mxu0 %v1305_v19 }
 0x23b   :  { %1058 = vmatpush3.bf16.msra.mxu0 %v1190_v40 }
 0x23c   :  { %1059 = vmatprep.subr.bf16.mxu0 %v1305_v19 }
 0x23f   :  { %1060 = vmatpush3.bf16.msra.mxu0 %v1191_v41 }
 0x2f5   :  { %v1021_v48 = vpop.f32.mrb[4].mxu0 }
 0x2f6   :  { %v1022_v50 = vpop.f32.mrb[5].mxu0 }
 0x2f7   :  { %v1023_v51 = vadd.f32 %v1022_v50, %v1021_v48  ;;  %v1024_v52 = vpop.f32.mrb[6].mxu0 }
 0x2f8   :  { %v1025_v53 = vpop.f32.mrb[7].mxu0 }
 0x2f9   :  { %v667_v55 = vadd.f32 %v1023_v51, %v970_v49 }
 0x2fb   :  { %v672_v56 = vmax.f32 %v667_v55, 0.0 }
 0x2fd   :  { %v674_v57 = vadd.f32 %v673_v54, %v672_v56 }
 0x2ff   :  { %v675_v58 = vpack.c.bf16 %v674_v57, %v674_v57 }
 0x301   :  { %1062 = vmatmul.mubr.bf16.vlgmr.msra.gmra.mrb[8].mxu0 %v675_v58 }
 0x3d4   :  { %v781_v63 = vpop.f32.mrb[8].mxu0 }
 0x3d5   :  { %v782_v0 = vadd.f32 %v987_v61, %v781_v63  ;;  %v1063_v1 = vpop.f32.mrb[9].mxu0 }
 0x3d6   :  { %v784_v2 = vpop.f32.mrb[10].mxu0 }
 0x3d7   :  { %v787_v28 = vmax.f32 %v782_v0, 0.0  ;;  %v1064_v3 = vpop.f32.mrb[11].mxu0 }
 0x3d9   :  { %v788_v4 = vpack.c.bf16 %v787_v28, %v787_v28  ;;  %v909_v13 = vadd.f32 %v787_v28, %v672_v56 }
 0x3db   :  { %1082 = vmatmul.mubr.bf16.vlgmr.msra.gmra.mrb[4].mxu1 %v788_v4 }
 0x4ae   :  { %v894_v6 = vpop.f32.mrb[4].mxu1 }
 0x4af   :  { %v895_v7 = vadd.f32 %v996_v5, %v894_v6  ;;  %v1083_v8 = vpop.f32.mrb[5].mxu1 }
 0x4b0   :  { %v897_v9 = vpop.f32.mrb[6].mxu1 }
 0x4b1   :  { %v907_v11 = vadd.f32 %v895_v7, %v667_v55  ;;  %v1084_v12 = vpop.f32.mrb[7].mxu1 }
 0x4b3   :  { %1200 = vtanh.f32 %v907_v11 }
 0x4bd   :  { %v1201_v14 = vpop.eup %1200 }
 0x4be   :  { %v912_v15 = vsel %vm906_vm5, %v1201_v14, %v909_v13 }
 0x4bf   :  { %v913_v16 = vpack.c.bf16 %v912_v15, %v912_v15 }
 0x4c1   :  { %914 = vst [vmem:[%s1502_s11] sm:$0xf] %v913_v16 }
 0x4c2   :  { %919 = vsyncpa [#allocation3], 1 }
 0x4c3   :  { %920 = vsyncpa [#allocation5], 1 }
 0x4c4   :  { %921 = vsyncpa [#allocation8], 1 }

</bundles_post_ra>
